<compile_context>
chip_gen: v7x
topology: tpu7x:2x2x1
jax: 0.10.0
libtpu: 0.0.40
codegen_flags: <defaults>
</compile_context>

<pallas_src>
import jax
import jax.numpy as jnp
from jax.experimental import pallas as pl
from jax.experimental.pallas import tpu as pltpu


def mil_attention_kernel(x_ref, mask_ref, w1_ref, b1_ref, w2_ref, out_ref):
    # x_ref:   (TB*N, H) bf16  -- TB bags x N instances, H on lanes
    # mask_ref:(TB, N)   f32   -- 1.0 = keep, 0.0 = masked out (lane-dense)
    # w1_ref:  (H, A)    bf16  (resident)
    # b1_ref:  (1, A)    f32
    # w2_ref:  (1, A)    f32   -- second Linear's weight as a row vector
    # out_ref: (TB, N)   f32   -- per-bag softmax over the N lanes
    tb, n = out_ref.shape

    # First projection on the MXU: bf16 inputs, f32 accumulation.
    h = jnp.tanh(
        jnp.dot(x_ref[...], w1_ref[...], preferred_element_type=jnp.float32)
        + b1_ref[...]
    )                                                          # (TB*N, A) f32

    # Second projection (output width 1) as VPU mul + XLU lane reduce.
    logits = jnp.sum(h * w2_ref[...], axis=-1, keepdims=True)  # (TB*N, 1)
    logits = logits.reshape(tb, n)                             # (TB, N)

    # Mask fill, then softmax over the instance axis (PyTorch dim=2).
    mask = mask_ref[...]
    logits = jnp.where(mask > 0.5, logits, jnp.float32(-1e25))
    m = jnp.max(logits, axis=-1, keepdims=True)
    e = jnp.exp(logits - m)
    s = jnp.sum(e, axis=-1, keepdims=True)
    out_ref[...] = e / s


def mil_attention(x, input_masks, w1, b1, w2, b2):
    """x: [B, G, N, H]; input_masks: [B, G, N] bool. Returns [B, G, N, 1]."""
    B, G, N, H = x.shape
    A = w1.shape[1]
    BG = B * G

    # Pick TB so each grid step processes >=~512 matmul rows (fills the MXU
    # and amortizes per-step overhead), while keeping block dims legal
    # (second-to-last dim multiple of 8, or equal to the full array dim).
    target_tb = max(1, 512 // max(N, 1))
    if BG <= target_tb:
        TB = BG                      # single block: block dims == full dims
    else:
        TB = target_tb
        while TB % 8 != 0:
            TB += 1
    BG_pad = pl.cdiv(BG, TB) * TB

    xf = x.reshape(BG, N, H)
    mf = input_masks.reshape(BG, N).astype(jnp.float32)
    if BG_pad != BG:
        pad = BG_pad - BG
        xf = jnp.concatenate([xf, jnp.zeros((pad, N, H), xf.dtype)], axis=0)
        mf = jnp.concatenate([mf, jnp.ones((pad, N), mf.dtype)], axis=0)

    x2d = xf.reshape(BG_pad * N, H).astype(jnp.bfloat16)   # bf16 HBM traffic
    w1b = w1.astype(jnp.bfloat16)
    b1r = b1.reshape(1, A).astype(jnp.float32)
    w2r = w2.reshape(1, A).astype(jnp.float32)
    # b2 is intentionally not passed: softmax is invariant to the shared shift.

    grid = (BG_pad // TB,)
    out = pl.pallas_call(
        mil_attention_kernel,
        out_shape=jax.ShapeDtypeStruct((BG_pad, N), jnp.float32),
        grid_spec=pltpu.PrefetchScalarGridSpec(
            num_scalar_prefetch=0,
            grid=grid,
            in_specs=[
                pl.BlockSpec((TB * N, H), lambda i: (i, 0)),  # x rows per block
                pl.BlockSpec((TB, N), lambda i: (i, 0)),      # mask (lane-dense)
                pl.BlockSpec((H, A), lambda i: (0, 0)),       # w1 (resident)
                pl.BlockSpec((1, A), lambda i: (0, 0)),       # b1
                pl.BlockSpec((1, A), lambda i: (0, 0)),       # w2 row
            ],
            out_specs=pl.BlockSpec((TB, N), lambda i: (i, 0)),
        ),
        compiler_params=pltpu.CompilerParams(
            dimension_semantics=("parallel",),      # shards blocks on v7x's 2 TCs
            vmem_limit_bytes=32 * 1024 * 1024,      # raise v5e's 16 MiB default;
                                                    # safe on v6e/v7x as well
        ),
    )(x2d, mf, w1b, b1r, w2r)

    return out[:BG].reshape(B, G, N, 1)


def mil_attention_ref(x, input_masks, w1, b1, w2, b2):
    # pure-JAX (f32) reference of the PyTorch forward
    a = jnp.tanh(jnp.einsum("bgnh,ha->bgna", x, w1) + b1)
    a = jnp.einsum("bgna,ao->bgno", a, w2) + b2                      # [B,G,N,1]
    a = jnp.where(input_masks[..., None], a, -1e25)
    return jax.nn.softmax(a, axis=2)


if __name__ == "__main__":
    B, G, N, H, A = 2, 4, 8, 32, 16

    key = jax.random.PRNGKey(0)
    kx, km, kw1, kb1, kw2, kb2 = jax.random.split(key, 6)

    x = jax.random.normal(kx, (B, G, N, H), dtype=jnp.float32)
    masks = jax.random.bernoulli(km, p=0.7, shape=(B, G, N))
    masks = masks.at[..., 0].set(True)  # ensure at least one valid instance per bag

    # deterministic "init" mimicking nn.Linear default scale (uniform in ±1/sqrt(fan_in))
    w1 = jax.random.uniform(kw1, (H, A), minval=-1.0, maxval=1.0) / jnp.sqrt(H)
    b1 = jax.random.uniform(kb1, (A,), minval=-1.0, maxval=1.0) / jnp.sqrt(H)
    w2 = jax.random.uniform(kw2, (A, 1), minval=-1.0, maxval=1.0) / jnp.sqrt(A)
    b2 = jax.random.uniform(kb2, (1,), minval=-1.0, maxval=1.0) / jnp.sqrt(A)

    out = mil_attention(x, masks, w1, b1, w2, b2)
    out = jax.block_until_ready(out)

    ref = mil_attention_ref(x, masks, w1, b1, w2, b2)
    assert out.shape == (B, G, N, 1)
    # bf16 inputs inside the kernel -> compare against the f32 reference with a
    # tolerance that covers the bf16 input rounding (estimated |dp| <~ 3e-3).
    assert jnp.allclose(out, ref, atol=2e-2, rtol=0.0), "mismatch vs reference"
    # per-bag probabilities must sum to 1
    assert jnp.allclose(out.sum(axis=2), 1.0, atol=1e-5)

    print("KERNEL_OK")
</pallas_src>

<mosaic_0001>
module attributes {stable_mosaic.version = 11 : i64} {
  func.func @mil_attention_kernel(%arg0: i32, %arg1: memref<64x32xbf16, #tpu.memory_space<vmem>>, %arg2: memref<8x8xf32, #tpu.memory_space<vmem>>, %arg3: memref<32x16xbf16, #tpu.memory_space<vmem>>, %arg4: memref<1x16xf32, #tpu.memory_space<vmem>>, %arg5: memref<1x16xf32, #tpu.memory_space<vmem>>, %arg6: memref<8x8xf32, #tpu.memory_space<vmem>>) attributes {dimension_semantics = [#tpu.dimension_semantics<parallel>], iteration_bounds = array<i64: 1>, scalar_prefetch = 0 : i64, scratch_operands = 0 : i64, tpu.core_type = #tpu.core_type<tc>, window_params = [{transform_indices = @transform_0, window_bounds = array<i64: 64, 32>}, {transform_indices = @transform_1, window_bounds = array<i64: 8, 8>}, {pipeline_mode = #tpu.pipeline_mode<synchronous>, transform_indices = @transform_2, window_bounds = array<i64: 32, 16>}, {pipeline_mode = #tpu.pipeline_mode<synchronous>, transform_indices = @transform_3, window_bounds = array<i64: 1, 16>}, {pipeline_mode = #tpu.pipeline_mode<synchronous>, transform_indices = @transform_4, window_bounds = array<i64: 1, 16>}, {transform_indices = @transform_5, window_bounds = array<i64: 8, 8>}]} {
    %c0 = arith.constant 0 : index
    %c0_0 = arith.constant 0 : index
    %0 = vector.load %arg1[%c0, %c0_0] : memref<64x32xbf16, #tpu.memory_space<vmem>>, vector<64x32xbf16>
    %c0_1 = arith.constant 0 : index
    %c0_2 = arith.constant 0 : index
    %1 = vector.load %arg3[%c0_1, %c0_2] : memref<32x16xbf16, #tpu.memory_space<vmem>>, vector<32x16xbf16>
    %cst = arith.constant dense<0.000000e+00> : vector<64x16xf32>
    %2 = tpu.matmul %0, %1, %cst {dimension_numbers = #tpu.dot_dimension_numbers<[1], [0], [0], [1], [0, 0, 1, 1], [], []>} : vector<64x32xbf16>, vector<32x16xbf16>, vector<64x16xf32> -> vector<64x16xf32>
    %c0_3 = arith.constant 0 : index
    %c0_4 = arith.constant 0 : index
    %3 = vector.load %arg4[%c0_3, %c0_4] : memref<1x16xf32, #tpu.memory_space<vmem>>, vector<1x16xf32>
    %4 = vector.broadcast %3 : vector<1x16xf32> to vector<64x16xf32>
    %5 = arith.addf %2, %4 : vector<64x16xf32>
    %6 = math.tanh %5 : vector<64x16xf32>
    %c0_5 = arith.constant 0 : index
    %c0_6 = arith.constant 0 : index
    %7 = vector.load %arg5[%c0_5, %c0_6] : memref<1x16xf32, #tpu.memory_space<vmem>>, vector<1x16xf32>
    %8 = vector.broadcast %7 : vector<1x16xf32> to vector<64x16xf32>
    %9 = arith.mulf %6, %8 : vector<64x16xf32>
    %cst_7 = arith.constant dense<0.000000e+00> : vector<64xf32>
    %10 = vector.multi_reduction <add>, %9, %cst_7 [1] : vector<64x16xf32> to vector<64xf32>
    %11 = vector.shape_cast %10 : vector<64xf32> to vector<64x1xf32>
    %12 = vector.shape_cast %11 : vector<64x1xf32> to vector<8x8xf32>
    %c0_8 = arith.constant 0 : index
    %c0_9 = arith.constant 0 : index
    %13 = vector.load %arg2[%c0_8, %c0_9] : memref<8x8xf32, #tpu.memory_space<vmem>>, vector<8x8xf32>
    %cst_10 = arith.constant 5.000000e-01 : f32
    %14 = vector.broadcast %cst_10 : f32 to vector<8x8xf32>
    %15 = arith.cmpf ogt, %13, %14 : vector<8x8xf32>
    %cst_11 = arith.constant -9.99999956E+24 : f32
    %16 = vector.broadcast %cst_11 : f32 to vector<8x8xf32>
    %17 = arith.select %15, %12, %16 : vector<8x8xi1>, vector<8x8xf32>
    %cst_12 = arith.constant dense<0xFF800000> : vector<8xf32>
    %18 = vector.multi_reduction <maximumf>, %17, %cst_12 [1] : vector<8x8xf32> to vector<8xf32>
    %19 = vector.shape_cast %18 : vector<8xf32> to vector<8x1xf32>
    %20 = vector.broadcast %19 : vector<8x1xf32> to vector<8x8xf32>
    %21 = arith.subf %17, %20 : vector<8x8xf32>
    %22 = math.exp %21 : vector<8x8xf32>
    %cst_13 = arith.constant dense<0.000000e+00> : vector<8xf32>
    %23 = vector.multi_reduction <add>, %22, %cst_13 [1] : vector<8x8xf32> to vector<8xf32>
    %24 = vector.shape_cast %23 : vector<8xf32> to vector<8x1xf32>
    %25 = vector.broadcast %24 : vector<8x1xf32> to vector<8x8xf32>
    %26 = arith.divf %22, %25 : vector<8x8xf32>
    %c0_14 = arith.constant 0 : index
    %c0_15 = arith.constant 0 : index
    %27 = vector.load %arg6[%c0_14, %c0_15] : memref<8x8xf32, #tpu.memory_space<vmem>>, vector<8x8xf32>
    tpu.vector_store %arg6[%c0_14, %c0_15], %26 {strides = array<i32>} : memref<8x8xf32, #tpu.memory_space<vmem>>, vector<8x8xf32>,
    return
  }
  func.func @transform_0(%arg0: i32) -> (i32, i32) {
    %c0_i32 = arith.constant 0 : i32
    %c0_i32_0 = arith.constant 0 : i32
    return %arg0, %c0_i32 : i32, i32
  }
  func.func @transform_1(%arg0: i32) -> (i32, i32) {
    %c0_i32 = arith.constant 0 : i32
    %c0_i32_0 = arith.constant 0 : i32
    return %arg0, %c0_i32 : i32, i32
  }
  func.func @transform_2(%arg0: i32) -> (i32, i32) {
    %c0_i32 = arith.constant 0 : i32
    %c0_i32_0 = arith.constant 0 : i32
    %c0_i32_1 = arith.constant 0 : i32
    return %c0_i32, %c0_i32_0 : i32, i32
  }
  func.func @transform_3(%arg0: i32) -> (i32, i32) {
    %c0_i32 = arith.constant 0 : i32
    %c0_i32_0 = arith.constant 0 : i32
    %c0_i32_1 = arith.constant 0 : i32
    return %c0_i32, %c0_i32_0 : i32, i32
  }
  func.func @transform_4(%arg0: i32) -> (i32, i32) {
    %c0_i32 = arith.constant 0 : i32
    %c0_i32_0 = arith.constant 0 : i32
    %c0_i32_1 = arith.constant 0 : i32
    return %c0_i32, %c0_i32_0 : i32, i32
  }
  func.func @transform_5(%arg0: i32) -> (i32, i32) {
    %c0_i32 = arith.constant 0 : i32
    %c0_i32_0 = arith.constant 0 : i32
    return %arg0, %c0_i32 : i32, i32
  }
}

</mosaic_0001>

<bundles_post_ra>
// kernel: tpu_custom_call.1
= control target key start
LH: loop header
LB: loop body
LE: loop exit
PB: predicated region body
PF: predicated region fallthrough
CT: control target
= control target key end

     0   :  { %vm73_vm0 = vcmask 261120   ;;  %s456_s0 = inlined_call_operand.vmem [shape: bf16[64,32], index: 0, kind: input, shape index: {}]   ;;  %s457_s1 = inlined_call_operand.vmem [shape: f32[8,8], index: 1, kind: input, shape index: {}]   ;;  %s458_s2 = inlined_call_operand.vmem [shape: bf16[32,16], index: 2, kind: input, shape index: {}]   ;;  %s459_s3 = inlined_call_operand.vmem [shape: f32[1,16], index: 3, kind: input, shape index: {}]   ;;  %s460_s4 = inlined_call_operand.vmem [shape: f32[1,16], index: 4, kind: input, shape index: {}]   ;;  %s461_s5 = inlined_call_operand.hbm [shape: f32[8,8], index: 5, kind: output, shape index: {}]  }
   0x1   :  { %v321_v0 = vld [vmem:[%s458_s2] sm:$0xff]   ;;  %v322_v1 = vld [vmem:[%s458_s2 + $0x8] sm:$0xff]   ;;  %v325_v3 = vld [vmem:[%s456_s0 + $0x10] sm:$0xff]  }
   0x2   :  { %304 = vmatprep.subr.bf16.mxu0 %v321_v0  ;;  %316 = vmatprep.subr.bf16.mxu1 %v321_v0  ;;  %v323_v2 = vld [vmem:[%s456_s0] sm:$0xff]   ;;  %v324_v4 = vld [vmem:[%s456_s0 + $0x8] sm:$0xff]   ;;  %v326_v5 = vld [vmem:[%s456_s0 + $0x18] sm:$0xff]  }
   0x3   :  { %305 = vmatpush3.bf16.msra.mxu0 %v321_v0  ;;  %318 = vmatpush3.bf16.msra.mxu1 %v321_v0 }
   0x4   :  { %306 = vmatprep.subr.bf16.mxu0 %v322_v1  ;;  %308 = vmatprep.mubr.msk.bf16.mxu0 %vm73_vm0, %v323_v2 }
   0x5   :  { %317 = vmatprep.subr.bf16.mxu1 %v322_v1  ;;  %312 = vmatprep.mubr.msk.bf16.mxu1 %vm73_vm0, %v325_v3 }
   0x6   :  { %10 = vsyncpa [#allocation3], 0  ;;  %v286_v6 = vld [vmem:[%s459_s3] ss:$0 sm:$0xff]  ;;  %vm174_vm1 = vcmask 130048   ;;  %v209_v48 = vlaneseq  ;;  %vm243_vm2 = vcmask 1041409  }
   0x7   :  { %307 = vmatpush3.bf16.msra.mxu0 %v322_v1  ;;  %319 = vmatpush3.bf16.msra.mxu1 %v322_v1  ;;  %v297_v23 = vld [vmem:[%s460_s4] ss:$0 sm:$0xff]  ;;  %vm245_vm3 = vcmask 1042434   ;;  %vm247_vm4 = vcmask 1043459   ;;  %vm249_vm5 = vcmask 1044484   ;;  %vm251_vm6 = vcmask 1045509  }
   0x8   :  { %v210_v49 = vand.u32 127, %v209_v48  ;;  %v212_v50 = vshrl.u32 %v209_v48, 7  ;;  %vm253_vm7 = vcmask 1046534   ;;  %vm255_vm8 = vcmask 1047559  }
   0x9   :  { %vm259_vm10 = vcmask 64512  }
   0xa   :  { %309 = vmatmul.mubr.msk.bf16.vlgmr.msra.gmra.mrb[0].mxu0 %vm73_vm0, %v324_v4  ;;  %313 = vmatmul.mubr.msk.bf16.vlgmr.msra.gmra.mrb[0].mxu1 %vm73_vm0, %v326_v5  ;;  %v213_v53 = vsub.s32 %v210_v49, %v212_v50  ;;  %v199_v4 = vld [vmem:[%s457_s1] sm:$0xff]  ;;  %s371_s1 = smov [#allocation2]  }
   0xb   :  { %vm200_vm9 = vcmp.gt.f32.partialorder %v199_v4, 0.5  ;;  %s278_s7 = sshll.u32 %s371_s1, 4  ;;  %s279_s7 = int_to_ptr.vmem [resolvable:$true] %s278_s7 }
   0xc   :  { %s347_s8 = scalar_lea.vmem %s279_s7, 128  ;;  %p352_p1 = scmp.lt.s32.totalorder %s279_s7, %s279_s7 }
   0xd   :  { %p348_p0 = scmp.ne.s32.totalorder %s279_s7, %s347_s8  ;;  %p353_p2 = scmp.lt.s32.totalorder %s347_s8, %s347_s8 }
   0xf   :  { %p354_p3 = por %p353_p2, %p352_p1 }
  0x11   :  { %p355_p4 = pnand %p354_p3, %p348_p0 }
  0xdd   :  { %v310_v7 = vpop.f32.mrb[0].mxu0  ;;  %v314_v8 = vpop.f32.mrb[0].mxu1 }
  0xde   :  { %v129_v9 = vadd.f32 %v310_v7, %v286_v6  ;;  %v120_v10 = vpop.f32.mrb[1].mxu0  ;;  %v136_v11 = vpop.f32.mrb[1].mxu1  ;;  %v145_v22 = vadd.f32 %v314_v8, %v286_v6 }
  0xdf   :  { %v121_v12 = vadd.f32 %v286_v6, %v120_v10  ;;  %v311_v13 = vpop.f32.mrb[2].mxu0  ;;  %v315_v14 = vpop.f32.mrb[2].mxu1  ;;  %v137_v19 = vadd.f32 %v286_v6, %v136_v11 }
  0xe0   :  { %327 = vtanh.f32 %v129_v9  ;;  %v132_v15 = vadd.f32 %v311_v13, %v286_v6  ;;  %v123_v16 = vpop.f32.mrb[3].mxu0  ;;  %v139_v17 = vpop.f32.mrb[3].mxu1  ;;  %v148_v21 = vadd.f32 %v315_v14, %v286_v6 }
  0xe1   :  { %329 = vtanh.f32 %v121_v12  ;;  %v124_v18 = vadd.f32 %v286_v6, %v123_v16  ;;  %v140_v20 = vadd.f32 %v286_v6, %v139_v17 }
  0xe2   :  { %331 = vtanh.f32 %v132_v15 }
  0xe3   :  { %333 = vtanh.f32 %v124_v18 }
  0xe4   :  { %335 = vtanh.f32 %v137_v19 }
  0xe5   :  { %337 = vtanh.f32 %v140_v20 }
  0xe6   :  { %339 = vtanh.f32 %v148_v21 }
  0xe7   :  { %341 = vtanh.f32 %v145_v22 }
  0xea   :  { %v328_v24 = vpop.eup %327 }
  0xeb   :  { %v330_v25 = vpop.eup %329  ;;  %v168_v26 = vmul.f32 %v328_v24, %v297_v23 }
  0xec   :  { %v332_v27 = vpop.eup %331  ;;  %v166_v28 = vmul.f32 %v330_v25, %v297_v23 }
  0xed   :  { %v334_v29 = vpop.eup %333  ;;  %v181_v30 = vsel %vm174_vm1, %v168_v26, 0.0  ;;  %v169_v31 = vmul.f32 %v332_v27, %v297_v23 }
  0xee   :  { %182 = vadd.xlane.f32.xlu1 %v181_v30  ;;  %v175_v32 = vsel %vm174_vm1, %v166_v28, 0.0  ;;  %v167_v33 = vmul.f32 %v334_v29, %v297_v23  ;;  %v336_v34 = vpop.eup %335 }
  0xef   :  { %176 = vadd.xlane.f32.xlu0 %v175_v32  ;;  %v338_v35 = vpop.eup %337  ;;  %v184_v36 = vsel %vm174_vm1, %v169_v31, 0.0  ;;  %v170_v40 = vmul.f32 %v336_v34, %v297_v23 }
  0xf0   :  { %v340_v37 = vpop.eup %339  ;;  %v178_v38 = vsel %vm174_vm1, %v167_v33, 0.0  ;;  %v171_v39 = vmul.f32 %v338_v35, %v297_v23 }
  0xf1   :  { %v342_v41 = vpop.eup %341  ;;  %v173_v43 = vmul.f32 %v340_v37, %v297_v23  ;;  %v187_v44 = vsel %vm174_vm1, %v170_v40, 0.0 }
  0xf2   :  { %185 = vadd.xlane.f32.xlu1 %v184_v36  ;;  %v190_v42 = vsel %vm174_vm1, %v171_v39, 0.0  ;;  %v172_v45 = vmul.f32 %v342_v41, %v297_v23 }
  0xf3   :  { %179 = vadd.xlane.f32.xlu0 %v178_v38  ;;  %v196_v46 = vsel %vm174_vm1, %v173_v43, 0.0 }
  0xf4   :  { %v193_v47 = vsel %vm174_vm1, %v172_v45, 0.0 }
  0xf6   :  { %191 = vadd.xlane.f32.xlu1 %v190_v42 }
  0xf7   :  { %188 = vadd.xlane.f32.xlu0 %v187_v44 }
  0xfa   :  { %197 = vadd.xlane.f32.xlu1 %v196_v46 }
  0xfb   :  { %194 = vadd.xlane.f32.xlu0 %v193_v47 }
 0x17b   :  { %v183_v51 = vpop.xlane.xlu1 %182 }
 0x17c   :  { %v177_v52 = vpop.xlane.xlu0 %176  ;;  %v222_v58 = vrot.slane %v183_v51, %v213_v53 }
 0x17d   :  { %v214_v56 = vrot.slane %v177_v52, %v213_v53 }
 0x17f   :  { %v186_v54 = vpop.xlane.xlu1 %185 }
 0x180   :  { %v180_v55 = vpop.xlane.xlu0 %179  ;;  %v226_v59 = vrot.slane %v186_v54, %v213_v53 }
 0x181   :  { %v218_v57 = vrot.slane %v180_v55, %v213_v53 }
 0x183   :  { %v244_v60 = vsel %vm243_vm2, %v218_v57, %v214_v56  ;;  %v192_v61 = vpop.xlane.xlu1 %191 }
 0x184   :  { %v246_v62 = vsel %vm245_vm3, %v222_v58, %v244_v60  ;;  %v189_v63 = vpop.xlane.xlu0 %188  ;;  %v234_v5 = vrot.slane %v192_v61, %v213_v53 }
 0x185   :  { %v248_v0 = vsel %vm247_vm4, %v226_v59, %v246_v62  ;;  %v230_v1 = vrot.slane %v189_v63, %v213_v53 }
 0x187   :  { %v250_v2 = vsel %vm249_vm5, %v230_v1, %v248_v0  ;;  %v198_v3 = vpop.xlane.xlu1 %197 }
 0x188   :  { %v195_v6 = vpop.xlane.xlu0 %194  ;;  %v242_v8 = vrot.slane %v198_v3, %v213_v53  ;;  %v252_v9 = vsel %vm251_vm6, %v234_v5, %v250_v2 }
 0x189   :  { %v238_v7 = vrot.slane %v195_v6, %v213_v53 }
 0x18b   :  { %v254_v10 = vsel %vm253_vm7, %v238_v7, %v252_v9 }
 0x18c   :  { %v256_v11 = vsel %vm255_vm8, %v242_v8, %v254_v10 }
 0x18d   :  { %v258_v12 = vsel %vm200_vm9, %v256_v11, -1e+25 }
 0x18e   :  { %v260_v13 = vsel %vm259_vm10, %v258_v12, -inf }
 0x18f   :  { %261 = vmax.xlane.f32.xlu0 %v260_v13 }
 0x21c   :  { %v262_v14 = vpop.xlane.xlu0 %261 }
 0x21d   :  { %v263_v15 = vsub.f32 %v258_v12, %v262_v14 }
 0x21f   :  { %v264_v16 = vmul.f32 1.442695, %v263_v15 }
 0x221   :  { %343 = vpow2.f32 %v264_v16 }
 0x22b   :  { %v344_v17 = vpop.eup %343 }
 0x22c   :  { %v266_v18 = vsel %vm259_vm10, %v344_v17, 0.0 }
 0x22d   :  { %267 = vadd.xlane.f32.xlu1 %v266_v18 }
 0x2ba   :  { %v268_v19 = vpop.xlane.xlu1 %267 }
 0x2bb   :  { %345 = vrcp.f32 %v268_v19 }
 0x2c5   :  { %v346_v20 = vpop.eup %345 }
 0x2c6   :  { %v270_v21 = vmul.f32 %v346_v20, %v344_v17 }
 0x2c8   :  { %271 = vst.msk [vmem:[#allocation2] sm:$0xff] %vm259_vm10, %v270_v21 }
 0x2c9   :  { %358 = shalt.err (!%p355_p4)
}
 0x2ca   :  { %s359_s11 = scalar_lea.hbm %s461_s5, 128 }
 0x2cb   :  { %p360_p5 = scmp.ne.s32.totalorder %s461_s5, %s359_s11  ;;  %p363_p6 = scmp.lt.u32.totalorder %s359_s11, %s461_s5 }
 0x2cd   :  { %p365_p7 = pnand %p363_p6, %p360_p5 }
 0x2cf   :  { %368 = shalt.err (!%p365_p7)
}
 0x2d0   :  { %281 = dma.vmem_to_hbm [thread:$0]  %s279_s7, 128, %s461_s5, [#allocation3]  }
 0x2d1   :  { %369 = dma.done.wait [#allocation3], 128  }
 0x2d2   :  { %370 = vsyncadd [#allocation3], 4294967168 }
 0x2d3   :  { %285 = vsyncpa [#allocation3], 1 }

</bundles_post_ra>
